<compile_context>
chip_gen: v6e
topology: v6e:2x2x1
jax: 0.10.0
libtpu: 0.0.40
codegen_flags: <defaults>
</compile_context>

<pallas_src>
import numpy as np
import jax
import jax.numpy as jnp
from jax import lax
from jax.experimental import pallas as pl
from jax.experimental.pallas import tpu as pltpu

_LN_EPS = 1e-5
_NEG_INF = -1e9


# --------------------------------------------------------------------------- tiling utils


def _pick_tile(dim, pref, mult=8):
    """Largest divisor of `dim` that is <= pref and a multiple of `mult`; else full dim."""
    t = min(dim, pref)
    t -= t % mult
    while t >= mult:
        if dim % t == 0:
            return t
        t -= mult
    return dim


def _pick_lane_tile(dim, pref):
    """Tile for a lane (last) dim: must be a multiple of 128 or the full dim."""
    t = min(dim, pref)
    t -= t % 128
    while t >= 128:
        if dim % t == 0:
            return t
        t -= 128
    return dim


# --------------------------------------------------------------------------- projection kernels


def _matmul_bias_kernel(x_ref, w_ref, b_ref, o_ref, acc_ref):
    # N/K-tiled x @ W + b ; f32 accumulation across the K grid axis.
    kk = pl.program_id(2)

    @pl.when(kk == 0)
    def _():
        acc_ref[...] = jnp.zeros_like(acc_ref)

    acc_ref[...] += jnp.dot(x_ref[...], w_ref[...], preferred_element_type=jnp.float32)

    @pl.when(kk == pl.num_programs(2) - 1)
    def _():
        o_ref[...] = (acc_ref[...] + b_ref[...]).astype(o_ref.dtype)


def _linear(x, w, b, out_dtype=jnp.bfloat16, row_block=256, n_block=512, k_block=512):
    M, d_in = x.shape
    d_out = w.shape[1]
    tm = _pick_tile(M, row_block, 8)
    tn = _pick_lane_tile(d_out, n_block)
    tk = _pick_lane_tile(d_in, k_block)
    return pl.pallas_call(
        _matmul_bias_kernel,
        out_shape=jax.ShapeDtypeStruct((M, d_out), out_dtype),
        grid=(M // tm, d_out // tn, d_in // tk),
        in_specs=[
            pl.BlockSpec((tm, tk), lambda i, j, k: (i, k)),
            pl.BlockSpec((tk, tn), lambda i, j, k: (k, j)),
            pl.BlockSpec((1, tn), lambda i, j, k: (0, j)),
        ],
        out_specs=pl.BlockSpec((tm, tn), lambda i, j, k: (i, j)),
        scratch_shapes=[pltpu.VMEM((tm, tn), jnp.float32)],
        compiler_params=pltpu.CompilerParams(
            dimension_semantics=("parallel", "parallel", "arbitrary")),
    )(x, w, b)


def _fc_res_ln_kernel(x_ref, w_ref, res_ref, b_ref, g_ref, beta_ref, o_ref, acc_ref):
    # fused output projection (K-tiled) + residual add + layernorm (stats in f32,
    # full d_out kept per row block so the LN statistics see the whole row).
    kk = pl.program_id(1)

    @pl.when(kk == 0)
    def _():
        acc_ref[...] = jnp.zeros_like(acc_ref)

    acc_ref[...] += jnp.dot(x_ref[...], w_ref[...], preferred_element_type=jnp.float32)

    @pl.when(kk == pl.num_programs(1) - 1)
    def _():
        y = acc_ref[...] + b_ref[...] + res_ref[...].astype(jnp.float32)
        mu = jnp.mean(y, axis=-1, keepdims=True)
        var = jnp.mean((y - mu) ** 2, axis=-1, keepdims=True)
        o_ref[...] = ((y - mu) * lax.rsqrt(var + _LN_EPS) * g_ref[...]
                      + beta_ref[...]).astype(o_ref.dtype)


def _fc_residual_layernorm(x, residual, w, b, g, beta, out_dtype=jnp.float32,
                           row_block=128, k_block=256):
    M, d_in = x.shape
    d_out = w.shape[1]
    tm = _pick_tile(M, row_block, 8)
    tk = _pick_lane_tile(d_in, k_block)
    return pl.pallas_call(
        _fc_res_ln_kernel,
        out_shape=jax.ShapeDtypeStruct((M, d_out), out_dtype),
        grid=(M // tm, d_in // tk),
        in_specs=[
            pl.BlockSpec((tm, tk), lambda i, k: (i, k)),
            pl.BlockSpec((tk, d_out), lambda i, k: (k, 0)),
            pl.BlockSpec((tm, d_out), lambda i, k: (i, 0)),   # residual (bf16)
            pl.BlockSpec((1, d_out), lambda i, k: (0, 0)),
            pl.BlockSpec((1, d_out), lambda i, k: (0, 0)),
            pl.BlockSpec((1, d_out), lambda i, k: (0, 0)),
        ],
        out_specs=pl.BlockSpec((tm, d_out), lambda i, k: (i, 0)),
        scratch_shapes=[pltpu.VMEM((tm, d_out), jnp.float32)],
        compiler_params=pltpu.CompilerParams(
            dimension_semantics=("parallel", "arbitrary")),
    )(x, w, residual, b, g, beta)


# --------------------------------------------------------------------------- attention kernels
# All attention inputs are 5-D (B, L, n_slots, 1, d_k): the (qkv-slot, head) is picked
# via the BlockSpec index_map, so no head-split transpose ever hits HBM. Output is
# written as (B, Lq, n_head, 1, d_v) so the head merge is a free reshape.


def _make_flash_lens_kernel(causal, tq, tk):
    """Flash attention with the mask built in-kernel from scalar-prefetched key lens."""

    def kernel(lens_ref, q_ref, k_ref, v_ref, o_ref, m_sc, l_sc, acc_sc):
        b = pl.program_id(1)
        qi = pl.program_id(2)
        ki = pl.program_id(3)
        k_start = ki * tk
        kv_len = lens_ref[b]

        @pl.when(ki == 0)
        def _():
            m_sc[...] = jnp.full_like(m_sc, -jnp.inf)
            l_sc[...] = jnp.zeros_like(l_sc)
            acc_sc[...] = jnp.zeros_like(acc_sc)

        # skip k-tiles that are entirely past the valid length / above the causal diag
        needed = k_start < kv_len
        if causal:
            needed = jnp.logical_and(needed, k_start <= qi * tq + (tq - 1))

        @pl.when(needed)
        def _():
            # q already carries the 1/sqrt(d_k) scale (folded into the projection).
            s = lax.dot_general(q_ref[...], k_ref[...], (((1,), (1,)), ((), ())),
                                preferred_element_type=jnp.float32)   # (tq, tk)
            key_idx = k_start + lax.broadcasted_iota(jnp.int32, (tq, tk), 1)
            valid = key_idx < kv_len
            if causal:
                q_idx = qi * tq + lax.broadcasted_iota(jnp.int32, (tq, tk), 0)
                valid = jnp.logical_and(valid, key_idx <= q_idx)
            s = jnp.where(valid, s, _NEG_INF)

            m_prev = m_sc[...]
            m_new = jnp.maximum(m_prev, jnp.max(s, axis=-1, keepdims=True))
            alpha = jnp.exp(m_prev - m_new)
            p = jnp.exp(s - m_new)
            l_sc[...] = alpha * l_sc[...] + jnp.sum(p, axis=-1, keepdims=True)
            acc_sc[...] = alpha * acc_sc[...] + jnp.dot(
                p.astype(v_ref.dtype), v_ref[...], preferred_element_type=jnp.float32)
            m_sc[...] = m_new

        @pl.when(ki == pl.num_programs(3) - 1)
        def _():
            inv = pl.reciprocal(l_sc[...], approx=True)
            o_ref[...] = (acc_sc[...] * inv).astype(o_ref.dtype)
            # NOTE: rows with kv_len == 0 produce NaN here (no valid key at all).

    return kernel


def _flash_attention_lens(q_arr, k_arr, v_arr, q_slot, k_slot, v_slot, n_head,
                          key_lens, causal, q_block=512, k_block=512):
    B, Lq, _, _, d_k = q_arr.shape
    Lk = k_arr.shape[1]
    d_v = v_arr.shape[4]
    tq = _pick_tile(Lq, q_block, 8)
    tk = _pick_lane_tile(Lk, k_block)
    sq = pl.Squeezed()
    kernel = _make_flash_lens_kernel(causal, tq, tk)
    return pl.pallas_call(
        kernel,
        out_shape=jax.ShapeDtypeStruct((B, Lq, n_head, 1, d_v), jnp.bfloat16),
        grid_spec=pltpu.PrefetchScalarGridSpec(
            num_scalar_prefetch=1,
            grid=(n_head, B, Lq // tq, Lk // tk),
            in_specs=[
                pl.BlockSpec((sq, tq, sq, sq, d_k),
                             lambda h, b, qi, ki, lens: (b, qi, q_slot + h, 0, 0)),
                pl.BlockSpec((sq, tk, sq, sq, d_k),
                             lambda h, b, qi, ki, lens: (b, ki, k_slot + h, 0, 0)),
                pl.BlockSpec((sq, tk, sq, sq, d_k),
                             lambda h, b, qi, ki, lens: (b, ki, v_slot + h, 0, 0)),
            ],
            out_specs=pl.BlockSpec((sq, tq, sq, sq, d_v),
                                   lambda h, b, qi, ki, lens: (b, qi, h, 0, 0)),
            scratch_shapes=[
                pltpu.VMEM((tq, 1), jnp.float32),    # running max
                pltpu.VMEM((tq, 1), jnp.float32),    # running denom
                pltpu.VMEM((tq, d_v), jnp.float32),  # output accumulator
            ],
        ),
        compiler_params=pltpu.CompilerParams(
            dimension_semantics=("parallel", "parallel", "parallel", "arbitrary")),
    )(key_lens, q_arr, k_arr, v_arr)


def _flash_mask_kernel(q_ref, k_ref, v_ref, m_ref, o_ref, m_sc, l_sc, acc_sc):
    # Dense-mask fallback: int8 mask block streamed per inner step.
    ki = pl.program_id(3)

    @pl.when(ki == 0)
    def _():
        m_sc[...] = jnp.full_like(m_sc, -jnp.inf)
        l_sc[...] = jnp.zeros_like(l_sc)
        acc_sc[...] = jnp.zeros_like(acc_sc)

    s = lax.dot_general(q_ref[...], k_ref[...], (((1,), (1,)), ((), ())),
                        preferred_element_type=jnp.float32)
    s = jnp.where(m_ref[...] != 0, s, _NEG_INF)
    m_prev = m_sc[...]
    m_new = jnp.maximum(m_prev, jnp.max(s, axis=-1, keepdims=True))
    alpha = jnp.exp(m_prev - m_new)
    p = jnp.exp(s - m_new)
    l_sc[...] = alpha * l_sc[...] + jnp.sum(p, axis=-1, keepdims=True)
    acc_sc[...] = alpha * acc_sc[...] + jnp.dot(
        p.astype(v_ref.dtype), v_ref[...], preferred_element_type=jnp.float32)
    m_sc[...] = m_new

    @pl.when(ki == pl.num_programs(3) - 1)
    def _():
        inv = pl.reciprocal(l_sc[...], approx=True)
        o_ref[...] = (acc_sc[...] * inv).astype(o_ref.dtype)


def _flash_attention_mask(q_arr, k_arr, v_arr, q_slot, k_slot, v_slot, n_head,
                          mask_i8, q_block=512, k_block=512):
    # TODO(synk): add a scalar-prefetched per-(b, qi, ki) tile-validity table so fully
    # masked k-tiles are skipped in this dense fallback as well.
    B, Lq, _, _, d_k = q_arr.shape
    Lk = k_arr.shape[1]
    d_v = v_arr.shape[4]
    tq = _pick_tile(Lq, q_block, 8)
    tk = _pick_lane_tile(Lk, k_block)
    sq = pl.Squeezed()
    return pl.pallas_call(
        _flash_mask_kernel,
        out_shape=jax.ShapeDtypeStruct((B, Lq, n_head, 1, d_v), jnp.bfloat16),
        grid=(n_head, B, Lq // tq, Lk // tk),
        in_specs=[
            pl.BlockSpec((sq, tq, sq, sq, d_k),
                         lambda h, b, qi, ki: (b, qi, q_slot + h, 0, 0)),
            pl.BlockSpec((sq, tk, sq, sq, d_k),
                         lambda h, b, qi, ki: (b, ki, k_slot + h, 0, 0)),
            pl.BlockSpec((sq, tk, sq, sq, d_k),
                         lambda h, b, qi, ki: (b, ki, v_slot + h, 0, 0)),
            # mask shared across heads: the head index is simply ignored.
            pl.BlockSpec((sq, tq, tk), lambda h, b, qi, ki: (b, qi, ki)),
        ],
        out_specs=pl.BlockSpec((sq, tq, sq, sq, d_v),
                               lambda h, b, qi, ki: (b, qi, h, 0, 0)),
        scratch_shapes=[
            pltpu.VMEM((tq, 1), jnp.float32),
            pltpu.VMEM((tq, 1), jnp.float32),
            pltpu.VMEM((tq, d_v), jnp.float32),
        ],
        compiler_params=pltpu.CompilerParams(
            dimension_semantics=("parallel", "parallel", "parallel", "arbitrary")),
    )(q_arr, k_arr, v_arr, mask_i8)


def _attn_full_kernel(q_ref, k_ref, v_ref, m_ref, o_ref, a_ref):
    # Full-Lk softmax per q-tile; only used when the attention matrix must be returned.
    s = lax.dot_general(q_ref[...], k_ref[...], (((1,), (1,)), ((), ())),
                        preferred_element_type=jnp.float32)
    s = jnp.where(m_ref[...] != 0, s, _NEG_INF)
    s_max = jnp.max(s, axis=-1, keepdims=True)
    p = jnp.exp(s - s_max)
    inv = pl.reciprocal(jnp.sum(p, axis=-1, keepdims=True), approx=False)
    p = p * inv
    a_ref[...] = p
    o_ref[...] = jnp.dot(p.astype(v_ref.dtype), v_ref[...],
                         preferred_element_type=jnp.float32).astype(o_ref.dtype)


def _full_attention(q_arr, k_arr, v_arr, q_slot, k_slot, v_slot, n_head, mask_i8,
                    q_block=256):
    # TODO(synk): for very long keys, tile the Lk axis here too (flash pass for m/l then
    # a second normalized-probability pass); this path is not the perf-critical one.
    B, Lq, _, _, d_k = q_arr.shape
    Lk = k_arr.shape[1]
    d_v = v_arr.shape[4]
    tq = _pick_tile(Lq, q_block, 8)
    sq = pl.Squeezed()
    return pl.pallas_call(
        _attn_full_kernel,
        out_shape=(
            jax.ShapeDtypeStruct((B, Lq, n_head, 1, d_v), jnp.bfloat16),
            jax.ShapeDtypeStruct((n_head, B, Lq, Lk), jnp.float32),
        ),
        grid=(n_head, B, Lq // tq),
        in_specs=[
            pl.BlockSpec((sq, tq, sq, sq, d_k),
                         lambda h, b, qi: (b, qi, q_slot + h, 0, 0)),
            pl.BlockSpec((sq, Lk, sq, sq, d_k),
                         lambda h, b, qi: (b, 0, k_slot + h, 0, 0)),
            pl.BlockSpec((sq, Lk, sq, sq, d_k),
                         lambda h, b, qi: (b, 0, v_slot + h, 0, 0)),
            pl.BlockSpec((sq, tq, Lk), lambda h, b, qi: (b, qi, 0)),
        ],
        out_specs=(
            pl.BlockSpec((sq, tq, sq, sq, d_v), lambda h, b, qi: (b, qi, h, 0, 0)),
            pl.BlockSpec((sq, sq, tq, Lk), lambda h, b, qi: (h, b, qi, 0)),
        ),
        compiler_params=pltpu.CompilerParams(
            dimension_semantics=("parallel", "parallel", "parallel")),
    )(q_arr, k_arr, v_arr, mask_i8)


# --------------------------------------------------------------------------- module wrapper


def _prepare_params(params, n_head, d_model):
    d_k = d_model // n_head
    inv_temp = jnp.float32(1.0 / np.power(d_k, 0.5))
    # fold 1/sqrt(d_k) into the Q projection (weight AND bias) -> no per-score scaling.
    w_qkv = jnp.concatenate(
        [params["w_qs"] * inv_temp, params["w_ks"], params["w_vs"]], axis=1
    ).astype(jnp.bfloat16)
    b_qkv = (
        jnp.concatenate([params["b_qs"] * inv_temp, params["b_ks"], params["b_vs"]])
        .reshape(1, -1)
        .astype(jnp.float32)
    )
    w_fc = params["w_fc"].astype(jnp.bfloat16)
    b_fc = params["b_fc"].reshape(1, -1).astype(jnp.float32)
    ln_g = params["ln_g"].reshape(1, -1).astype(jnp.float32)
    ln_b = params["ln_b"].reshape(1, -1).astype(jnp.float32)
    return w_qkv, b_qkv, w_fc, b_fc, ln_g, ln_b


def _dense_mask(B, Lq, Lk, key_lens, causal):
    key_idx = jnp.arange(Lk, dtype=jnp.int32)
    if key_lens is None:
        m = jnp.ones((B, Lq, Lk), jnp.bool_)
    else:
        m = jnp.broadcast_to(key_idx[None, None, :] < key_lens[:, None, None],
                             (B, Lq, Lk))
    if causal:
        m = jnp.logical_and(
            m, key_idx[None, None, :] <= jnp.arange(Lq, dtype=jnp.int32)[None, :, None])
    return m.astype(jnp.int8)


def multi_head_attention(q, k, v, mask, params, n_head, *, key_lens=None, causal=False,
                         return_attn=True, q_block=512, k_block=512):
    """Forward pass of the MultiHeadAttention module.

    mask     : optional dense (B, Lq, Lk) 0/1 mask (1 = attend) — fallback path.
    key_lens : optional (B,) int32 valid-key counts; with `causal`, the mask is built
               in-kernel (no dense mask streamed) — preferred flash path.
    """
    B, Lq, D = q.shape
    Lk = k.shape[1]
    d_k = D // n_head
    d_v = d_k
    cd = jnp.bfloat16
    residual = q.reshape(B * Lq, D).astype(cd)   # bf16 residual stream

    w_qkv, b_qkv, w_fc, b_fc, ln_g, ln_b = _prepare_params(params, n_head, D)

    # ---- projections (no head-split transpose: free reshape to slot-indexed 5-D) ----
    if (q is k) and (k is v):
        # self-attention: one fused (d_model -> 3*d_model) matmul, input read once.
        qkv = _linear(q.reshape(B * Lq, D).astype(cd), w_qkv, b_qkv, out_dtype=cd)
        qkv = qkv.reshape(B, Lq, 3 * n_head, 1, d_k)
        q_arr = k_arr = v_arr = qkv
        q_slot, k_slot, v_slot = 0, n_head, 2 * n_head
    else:
        q_arr = _linear(q.reshape(B * Lq, D).astype(cd), w_qkv[:, :D], b_qkv[:, :D],
                        out_dtype=cd).reshape(B, Lq, n_head, 1, d_k)
        q_slot = 0
        if k is v:
            kv = _linear(k.reshape(B * Lk, D).astype(cd), w_qkv[:, D:], b_qkv[:, D:],
                         out_dtype=cd).reshape(B, Lk, 2 * n_head, 1, d_k)
            k_arr = v_arr = kv
            k_slot, v_slot = 0, n_head
        else:
            k_arr = _linear(k.reshape(B * Lk, D).astype(cd), w_qkv[:, D:2 * D],
                            b_qkv[:, D:2 * D], out_dtype=cd
                            ).reshape(B, Lk, n_head, 1, d_k)
            v_arr = _linear(v.reshape(B * Lk, D).astype(cd), w_qkv[:, 2 * D:],
                            b_qkv[:, 2 * D:], out_dtype=cd
                            ).reshape(B, Lk, n_head, 1, d_k)
            k_slot = v_slot = 0

    # ---- scaled dot-product attention -------------------------------------------
    attn = None
    if return_attn:
        mask_i8 = (mask.astype(jnp.int8) if mask is not None
                   else _dense_mask(B, Lq, Lk, key_lens, causal))
        out_h, attn = _full_attention(q_arr, k_arr, v_arr, q_slot, k_slot, v_slot,
                                      n_head, mask_i8, q_block=min(q_block, 256))
        attn = attn.reshape(n_head * B, Lq, Lk)
    elif (key_lens is not None) or causal or (mask is None):
        lens = (jnp.asarray(key_lens, jnp.int32) if key_lens is not None
                else jnp.full((B,), Lk, jnp.int32))
        out_h = _flash_attention_lens(q_arr, k_arr, v_arr, q_slot, k_slot, v_slot,
                                      n_head, lens, causal,
                                      q_block=q_block, k_block=k_block)
    else:
        out_h = _flash_attention_mask(q_arr, k_arr, v_arr, q_slot, k_slot, v_slot,
                                      n_head, mask.astype(jnp.int8),
                                      q_block=q_block, k_block=k_block)

    # merge heads: (B, Lq, n_head, 1, d_v) -> (B*Lq, n_head*d_v)  -- free reshape.
    # TODO(synk): pair heads per grid step to make the attention output store 128-lane
    # dense on v5e (currently d_v-wide).
    merged = out_h.reshape(B * Lq, n_head * d_v)

    # ---- fused output projection + residual + layernorm -------------------------
    out = _fc_residual_layernorm(merged, residual, w_fc, b_fc, ln_g, ln_b)
    # TODO(synk): nn.Dropout applied as identity (inference mode); RNG dropout omitted.
    return out.reshape(B, Lq, D), attn


# --------------------------------------------------------------------------- params


def init_params(key, n_head, d_model):
    d_k = d_model // n_head
    # replicates nn.init.normal_(..., std=np.sqrt(2.0/d_model + d_k)) (as written)
    std = float(np.sqrt(2.0 / d_model + d_k))
    xav = float(np.sqrt(2.0 / (n_head * d_k + d_model)))  # xavier_normal_
    bound = float(1.0 / np.sqrt(d_model))
    ks = jax.random.split(key, 8)
    # weights stored as (d_in, d_out) so kernels compute x @ W + b
    return {
        "w_qs": std * jax.random.normal(ks[0], (d_model, n_head * d_k), jnp.float32),
        "w_ks": std * jax.random.normal(ks[1], (d_model, n_head * d_k), jnp.float32),
        "w_vs": std * jax.random.normal(ks[2], (d_model, n_head * d_k), jnp.float32),
        "w_fc": xav * jax.random.normal(ks[3], (n_head * d_k, d_model), jnp.float32),
        "b_qs": jax.random.uniform(ks[4], (n_head * d_k,), jnp.float32, -bound, bound),
        "b_ks": jax.random.uniform(ks[5], (n_head * d_k,), jnp.float32, -bound, bound),
        "b_vs": jax.random.uniform(ks[6], (n_head * d_k,), jnp.float32, -bound, bound),
        "b_fc": jax.random.uniform(ks[7], (d_model,), jnp.float32, -bound, bound),
        "ln_g": jnp.ones((1, d_model), jnp.float32),
        "ln_b": jnp.zeros((1, d_model), jnp.float32),
    }


# --------------------------------------------------------------------------- reference
# Pure-JAX reference mirroring the kernel's dtype discipline (bf16 MXU inputs,
# f32 accumulation, f32 softmax / layernorm statistics, bf16 residual stream).


def ref_mha(q, k, v, mask, params, n_head):
    B, Lq, D = q.shape
    Lk = k.shape[1]
    d_k = D // n_head
    cd = jnp.bfloat16
    w_qkv, b_qkv, w_fc, b_fc, g, beta = _prepare_params(params, n_head, D)

    def proj(x, w, b):
        y = jnp.dot(x.reshape(-1, D).astype(cd), w, preferred_element_type=jnp.float32) + b
        return y.astype(cd)

    def split(x, L):
        return x.reshape(B, L, n_head, d_k).transpose(2, 0, 1, 3)

    qh = split(proj(q, w_qkv[:, :D], b_qkv[:, :D]), Lq)
    kh = split(proj(k, w_qkv[:, D:2 * D], b_qkv[:, D:2 * D]), Lk)
    vh = split(proj(v, w_qkv[:, 2 * D:], b_qkv[:, 2 * D:]), Lk)

    s = jnp.einsum("hbqd,hbkd->hbqk", qh, kh, preferred_element_type=jnp.float32)
    s = jnp.where(mask[None] > 0, s, -1e9)
    attn = jax.nn.softmax(s, axis=-1)
    o = jnp.einsum("hbqk,hbkd->hbqd", attn.astype(cd), vh,
                   preferred_element_type=jnp.float32).astype(cd)
    merged = o.transpose(1, 2, 0, 3).reshape(B * Lq, n_head * d_k)

    y = jnp.dot(merged, w_fc, preferred_element_type=jnp.float32) + b_fc
    y = y + q.reshape(B * Lq, D).astype(cd).astype(jnp.float32)
    mu = jnp.mean(y, axis=-1, keepdims=True)
    var = jnp.mean((y - mu) ** 2, axis=-1, keepdims=True)
    y = (y - mu) * lax.rsqrt(var + _LN_EPS) * g + beta
    return y.reshape(B, Lq, D), attn.reshape(n_head * B, Lq, Lk)


# --------------------------------------------------------------------------- main

if __name__ == "__main__":
    n_head, d_model = 4, 32
    B, L = 2, 8

    key = jax.random.PRNGKey(0)
    kx, kq, kk, kv, kp = jax.random.split(key, 5)
    params = init_params(kp, n_head, d_model)

    # ---- Test 1: self-attention, causal ------------------------------------------
    x = jax.random.normal(kx, (B, L, d_model), jnp.float32)
    causal_m = jnp.tril(jnp.ones((L, L), jnp.float32))[None].repeat(B, axis=0)
    out_ref, attn_ref = ref_mha(x, x, x, causal_m, params, n_head)

    # (a) module-style output (incl. attention matrix), dense int8 mask, fused QKV.
    out, attn = multi_head_attention(x, x, x, causal_m, params, n_head, return_attn=True)
    out = jax.block_until_ready(out)
    attn = jax.block_until_ready(attn)
    np.testing.assert_allclose(np.asarray(out), np.asarray(out_ref), rtol=1e-2, atol=1e-2)
    np.testing.assert_allclose(np.asarray(attn), np.asarray(attn_ref), rtol=1e-2, atol=2e-3)
    assert out.shape == (B, L, d_model) and attn.shape == (n_head * B, L, L)

    # (b) flash path with the causal mask built in-kernel (no mask stream at all).
    out_f, _ = multi_head_attention(x, x, x, None, params, n_head,
                                    causal=True, return_attn=False)
    out_f = jax.block_until_ready(out_f)
    np.testing.assert_allclose(np.asarray(out_f), np.asarray(out_ref), rtol=1e-2, atol=1e-2)

    # ---- Test 2: cross-attention, padded keys (multi-step online softmax + skipping) --
    Lk = 256
    q2 = jax.random.normal(kq, (B, L, d_model), jnp.float32)
    k2 = jax.random.normal(kk, (B, Lk, d_model), jnp.float32)
    v2 = jax.random.normal(kv, (B, Lk, d_model), jnp.float32)
    lens = jnp.array([200, 77], jnp.int32)
    pad_mask = (jnp.arange(Lk)[None, None, :] < lens[:, None, None]).astype(jnp.float32)
    pad_mask = jnp.broadcast_to(pad_mask, (B, L, Lk))
    out2_ref, _ = ref_mha(q2, k2, v2, pad_mask, params, n_head)

    # (a) flash with scalar-prefetched key lengths (mask built in-kernel, tile skipping)
    out2, _ = multi_head_attention(q2, k2, v2, None, params, n_head, key_lens=lens,
                                   return_attn=False, k_block=128)
    out2 = jax.block_until_ready(out2)
    np.testing.assert_allclose(np.asarray(out2), np.asarray(out2_ref), rtol=1e-2, atol=1e-2)

    # (b) flash fallback with a dense int8 mask stream (arbitrary-mask path)
    out2b, _ = multi_head_attention(q2, k2, v2, pad_mask, params, n_head,
                                    return_attn=False, k_block=128)
    out2b = jax.block_until_ready(out2b)
    np.testing.assert_allclose(np.asarray(out2b), np.asarray(out2_ref), rtol=1e-2, atol=1e-2)

    # (c) k is v -> fused KV projection branch
    out3_ref, _ = ref_mha(q2, k2, k2, pad_mask, params, n_head)
    out3, _ = multi_head_attention(q2, k2, k2, None, params, n_head, key_lens=lens,
                                   return_attn=False, k_block=128)
    out3 = jax.block_until_ready(out3)
    np.testing.assert_allclose(np.asarray(out3), np.asarray(out3_ref), rtol=1e-2, atol=1e-2)

    print("KERNEL_OK")
</pallas_src>

<mosaic_0001>
module attributes {stable_mosaic.version = 11 : i64} {
  func.func @_matmul_bias_kernel(%arg0: i32, %arg1: i32, %arg2: i32, %arg3: memref<16x32xbf16, #tpu.memory_space<vmem>>, %arg4: memref<32x96xbf16, #tpu.memory_space<vmem>>, %arg5: memref<1x96xf32, #tpu.memory_space<vmem>>, %arg6: memref<16x96xbf16, #tpu.memory_space<vmem>>, %arg7: memref<16x96xf32, #tpu.memory_space<vmem>>) attributes {dimension_semantics = [#tpu.dimension_semantics<parallel>, #tpu.dimension_semantics<parallel>, #tpu.dimension_semantics<arbitrary>], iteration_bounds = array<i64: 1, 1, 1>, scalar_prefetch = 0 : i64, scratch_operands = 1 : i64, tpu.core_type = #tpu.core_type<tc>, window_params = [{transform_indices = @transform_0, window_bounds = array<i64: 16, 32>}, {transform_indices = @transform_1, window_bounds = array<i64: 32, 96>}, {transform_indices = @transform_2, window_bounds = array<i64: 1, 96>}, {transform_indices = @transform_3, window_bounds = array<i64: 16, 96>}]} {
    %c0_i32 = arith.constant 0 : i32
    %0 = arith.cmpi eq, %arg2, %c0_i32 : i32
    %1 = arith.extui %0 : i1 to i32
    %c0_i32_0 = arith.constant 0 : i32
    %2 = arith.cmpi ne, %1, %c0_i32_0 : i32
    scf.if %2 {
      %cst_10 = arith.constant 0.000000e+00 : f32
      %12 = vector.broadcast %cst_10 : f32 to vector<16x96xf32>
      %c0_11 = arith.constant 0 : index
      %c0_12 = arith.constant 0 : index
      %13 = vector.load %arg7[%c0_11, %c0_12] : memref<16x96xf32, #tpu.memory_space<vmem>>, vector<16x96xf32>
      tpu.vector_store %arg7[%c0_11, %c0_12], %12 {strides = array<i32>} : memref<16x96xf32, #tpu.memory_space<vmem>>, vector<16x96xf32>,
    } else {
    }
    %c0 = arith.constant 0 : index
    %c0_1 = arith.constant 0 : index
    %3 = vector.load %arg7[%c0, %c0_1] : memref<16x96xf32, #tpu.memory_space<vmem>>, vector<16x96xf32>
    %c0_2 = arith.constant 0 : index
    %c0_3 = arith.constant 0 : index
    %4 = vector.load %arg3[%c0_2, %c0_3] : memref<16x32xbf16, #tpu.memory_space<vmem>>, vector<16x32xbf16>
    %c0_4 = arith.constant 0 : index
    %c0_5 = arith.constant 0 : index
    %5 = vector.load %arg4[%c0_4, %c0_5] : memref<32x96xbf16, #tpu.memory_space<vmem>>, vector<32x96xbf16>
    %cst = arith.constant dense<0.000000e+00> : vector<16x96xf32>
    %6 = tpu.matmul %4, %5, %cst {dimension_numbers = #tpu.dot_dimension_numbers<[1], [0], [0], [1], [0, 0, 1, 1], [], []>} : vector<16x32xbf16>, vector<32x96xbf16>, vector<16x96xf32> -> vector<16x96xf32>
    %7 = arith.addf %3, %6 : vector<16x96xf32>
    %c0_6 = arith.constant 0 : index
    %c0_7 = arith.constant 0 : index
    %8 = vector.load %arg7[%c0_6, %c0_7] : memref<16x96xf32, #tpu.memory_space<vmem>>, vector<16x96xf32>
    tpu.vector_store %arg7[%c0_6, %c0_7], %7 {strides = array<i32>} : memref<16x96xf32, #tpu.memory_space<vmem>>, vector<16x96xf32>,
    %c0_i32_8 = arith.constant 0 : i32
    %9 = arith.cmpi eq, %arg2, %c0_i32_8 : i32
    %10 = arith.extui %9 : i1 to i32
    %c0_i32_9 = arith.constant 0 : i32
    %11 = arith.cmpi ne, %10, %c0_i32_9 : i32
    scf.if %11 {
      %c0_10 = arith.constant 0 : index
      %c0_11 = arith.constant 0 : index
      %12 = vector.load %arg7[%c0_10, %c0_11] : memref<16x96xf32, #tpu.memory_space<vmem>>, vector<16x96xf32>
      %c0_12 = arith.constant 0 : index
      %c0_13 = arith.constant 0 : index
      %13 = vector.load %arg5[%c0_12, %c0_13] : memref<1x96xf32, #tpu.memory_space<vmem>>, vector<1x96xf32>
      %14 = vector.broadcast %13 : vector<1x96xf32> to vector<16x96xf32>
      %15 = arith.addf %12, %14 : vector<16x96xf32>
      %16 = arith.truncf %15 : vector<16x96xf32> to vector<16x96xbf16>
      %c0_14 = arith.constant 0 : index
      %c0_15 = arith.constant 0 : index
      %17 = vector.load %arg6[%c0_14, %c0_15] : memref<16x96xbf16, #tpu.memory_space<vmem>>, vector<16x96xbf16>
      tpu.vector_store %arg6[%c0_14, %c0_15], %16 {strides = array<i32>} : memref<16x96xbf16, #tpu.memory_space<vmem>>, vector<16x96xbf16>,
    } else {
    }
    return
  }
  func.func @transform_0(%arg0: i32, %arg1: i32, %arg2: i32) -> (i32, i32) {
    %c0_i32 = arith.constant 0 : i32
    return %arg0, %arg2 : i32, i32
  }
  func.func @transform_1(%arg0: i32, %arg1: i32, %arg2: i32) -> (i32, i32) {
    %c0_i32 = arith.constant 0 : i32
    return %arg2, %arg1 : i32, i32
  }
  func.func @transform_2(%arg0: i32, %arg1: i32, %arg2: i32) -> (i32, i32) {
    %c0_i32 = arith.constant 0 : i32
    %c0_i32_0 = arith.constant 0 : i32
    return %c0_i32, %arg1 : i32, i32
  }
  func.func @transform_3(%arg0: i32, %arg1: i32, %arg2: i32) -> (i32, i32) {
    %c0_i32 = arith.constant 0 : i32
    return %arg0, %arg1 : i32, i32
  }
}

</mosaic_0001>

<bundles_post_ra>
// kernel: tpu_custom_call.1
= control target key start
LH: loop header
LB: loop body
LE: loop exit
PB: predicated region body
PF: predicated region fallthrough
CT: control target
= control target key end

     0   :  { %8 = vsyncpa [#allocation4], 0  ;;  %s317_s0 = inlined_call_operand.hbm [shape: bf16[16,32], index: 0, kind: input, shape index: {}]   ;;  %s318_s1 = inlined_call_operand.hbm [shape: bf16[32,96], index: 1, kind: input, shape index: {}]   ;;  %s319_s2 = inlined_call_operand.vmem [shape: f32[1,96], index: 2, kind: input, shape index: {}]   ;;  %s320_s3 = inlined_call_operand.hbm [shape: bf16[16,96], index: 3, kind: output, shape index: {}]  }
   0x1   :  { %9 = vsyncpa [#allocation7], 0 }
   0x2   :  { %10 = vsyncpa [#allocation5], 0  ;;  %s265_s12 = smov [#allocation3]  }
   0x3   :  { %s16_s13 = sshll.u32 %s265_s12, 4  ;;  %s17_s13 = int_to_ptr.vmem [resolvable:$true] %s16_s13 }
   0x4   :  { %s207_s14 = scalar_lea.vmem %s17_s13, 128  ;;  %p212_p1 = scmp.lt.s32.totalorder %s17_s13, %s17_s13 }
   0x5   :  { %p208_p0 = scmp.ne.s32.totalorder %s17_s13, %s207_s14  ;;  %p213_p2 = scmp.lt.s32.totalorder %s207_s14, %s207_s14 }
   0x7   :  { %p214_p3 = por %p213_p2, %p212_p1 }
   0x9   :  { %p215_p4 = pnand %p214_p3, %p208_p0 }
   0xb   :  { %218 = shalt.err (!%p215_p4)
}
   0xc   :  { %s266_s15 = smov 64   ;;  %s267_s16 = smov 4  }
   0xd   :  { %22 = dma.hbm_to_vmem [thread:$0]  %s317_s0, 128, %s17_s13, [#allocation4], %s266_s15, %s266_s15, %s267_s16  }
   0xe   :  { %s268_s19 = smov [#allocation6]  }
   0xf   :  { %s28_s20 = sshll.u32 %s268_s19, 4  ;;  %s29_s20 = int_to_ptr.vmem [resolvable:$true] %s28_s20 }
  0x10   :  { %s227_s21 = scalar_lea.vmem %s29_s20, 256  ;;  %p232_p6 = scmp.lt.s32.totalorder %s29_s20, %s29_s20 }
  0x11   :  { %p228_p5 = scmp.ne.s32.totalorder %s29_s20, %s227_s21  ;;  %p233_p7 = scmp.lt.s32.totalorder %s227_s21, %s227_s21 }
  0x13   :  { %p234_p8 = por %p233_p7, %p232_p6 }
  0x15   :  { %p235_p9 = pnand %p234_p8, %p228_p5 }
  0x17   :  { %238 = shalt.err (!%p235_p9)
}
  0x18   :  { %34 = dma.hbm_to_vmem [thread:$0]  %s318_s1, 256, %s29_s20, [#allocation7], %s266_s15, %s266_s15, %s267_s16  }
  0x19   :  { %259 = dma.done.wait [#allocation4], 128  }
  0x1a   :  { %260 = vsyncadd [#allocation4], 4294967168 }
  0x1b   :  { %261 = dma.done.wait [#allocation7], 256  }
  0x1c   :  { %262 = vsyncadd [#allocation7], 4294967040  ;;  %vm48_vm0 = vcmask 785408   ;;  %v269_v0 = vmov 0.0   ;;  %vm270_vm1 = vmmov 0   ;;  %v196_v1 = vld [vmem:[#allocation6 + $0x8] sm:$0xff]  }
  0x1d   :  { %49 = vst.msk [vmem:[#allocation2] sm:$0xff] %vm48_vm0, %v269_v0  ;;  %50 = vst.msk [vmem:[#allocation2 + $0x8] sm:$0xff] %vm48_vm0, %v269_v0  ;;  %181 = vmatprep.subr.bf16.mxu0 %v269_v0  ;;  %185 = vmatprep.mubr.msk.bf16.mxu0 %vm270_vm1, %v269_v0  ;;  %v197_v2 = vld [vmem:[#allocation6] sm:$0xff]   ;;  %v198_v3 = vld [vmem:[#allocation3] sm:$0xff]   ;;  %vm76_vm2 = vcmask 261120   ;;  %vm148_vm3 = vcmask 781312  }
  0x1e   :  { %182 = vmatpush3.bf16.msra.mxu0 %v196_v1  ;;  %v173_v12 = vld [vmem:[%s319_s2] ss:$0 sm:$0xff]  ;;  %s271_s24 = smov [#allocation8]  }
  0x1f   :  { %183 = vmatprep.subr.bf16.mxu0 %v269_v0  ;;  %s156_s25 = sshll.u32 %s271_s24, 4  ;;  %s157_s25 = int_to_ptr.vmem [resolvable:$true] %s156_s25 }
  0x20   :  { %s239_s26 = scalar_lea.vmem %s157_s25, 128  ;;  %p244_p11 = scmp.lt.s32.totalorder %s157_s25, %s157_s25 }
  0x21   :  { %p240_p10 = scmp.ne.s32.totalorder %s157_s25, %s239_s26  ;;  %p245_p12 = scmp.lt.s32.totalorder %s239_s26, %s239_s26 }
  0x22   :  { %184 = vmatpush3.bf16.msra.mxu0 %v197_v2 }
  0x23   :  { %p246_p13 = por %p245_p12, %p244_p11 }
  0x24   :  { %v51_v4 = vld [vmem:[#allocation2] sm:$0xff]  ;;  %v52_v8 = vld [vmem:[#allocation2 + $0x8] sm:$0xff] }
  0x25   :  { %186 = vmatmul.mubr.msk.bf16.vlgmr.msra.gmra.mxu0 %vm76_vm2, %v198_v3  ;;  %p247_p0 = pnand %p246_p13, %p240_p10 }
  0xe5   :  { %v114_v5 = vpop.f32.mrf.mxu0 }
  0xe6   :  { %v121_v6 = vadd.f32 %v114_v5, %v51_v4 }
  0xe7   :  { %v187_v7 = vpop.f32.mrf.mxu0 }
  0xe8   :  { %124 = vst.msk [vmem:[#allocation2] sm:$0xff] %vm48_vm0, %v121_v6 }
  0xe9   :  { %v117_v9 = vpop.f32.mrf.mxu0 }
  0xea   :  { %v122_v10 = vadd.f32 %v117_v9, %v52_v8 }
  0xeb   :  { %v188_v11 = vpop.f32.mrf.mxu0 }
  0xec   :  { %125 = vst.msk [vmem:[#allocation2 + $0x8] sm:$0xff] %vm48_vm0, %v122_v10 }
  0xef   :  { %v129_v13 = vld [vmem:[#allocation2] sm:$0xff] }
  0xf0   :  { %v138_v14 = vadd.f32 %v173_v12, %v129_v13 }
  0xf2   :  { %v176_v15 = vpack.c.bf16 %v138_v14, %v138_v14 }
  0xf3   :  { %v130_v16 = vld [vmem:[#allocation2 + $0x8] sm:$0xff] }
  0xf4   :  { %v139_v17 = vadd.f32 %v173_v12, %v130_v16  ;;  %149 = vst.msk [vmem:[#allocation8] sm:$0xf] %vm148_vm3, %v176_v15 }
  0xf6   :  { %v177_v18 = vpack.c.bf16 %v139_v17, %v139_v17 }
  0xf8   :  { %150 = vst.msk [vmem:[#allocation8 + $0x4] sm:$0xf] %vm148_vm3, %v177_v18 }
  0xf9   :  { %250 = shalt.err (!%p247_p0)
}
  0xfa   :  { %162 = dma.vmem_to_hbm [thread:$0]  %s157_s25, 128, %s320_s3, [#allocation5], %s266_s15, %s266_s15, %s267_s16  }
  0xfb   :  { %263 = dma.done.wait [#allocation5], 128  }
  0xfc   :  { %264 = vsyncadd [#allocation5], 4294967168 }
  0xfd   :  { %166 = vsyncpa [#allocation4], 1 }
  0xfe   :  { %167 = vsyncpa [#allocation7], 1 }
  0xff   :  { %168 = vsyncpa [#allocation5], 1 }

</bundles_post_ra>
